<compile_context>
chip_gen: v7x
topology: tpu7x:2x2x1
jax: 0.10.0
libtpu: 0.0.40
codegen_flags: <defaults>
</compile_context>

<pallas_src>
import functools

import numpy as np
import jax
import jax.numpy as jnp
from jax import lax
from jax.experimental import pallas as pl
from jax.experimental.pallas import tpu as pltpu

# ---- problem sizes (small, consistent with the module's forward) -------------
B, C = 2, 4
IMG_H = IMG_W = 16
N = IMG_H * IMG_W          # 256  (meas_op.N)
M = 128                    # number of Hadamard patterns (2M split measurements)
ITER_STOP = 3
ALPHA = 1.0                # SplitPoisson intensity


def _round_up(a, b):
    return (a + b - 1) // b * b


# ---- fused Pallas kernel: acquire + prep + LPGD (P eliminated) -----------------
def _fused_lpgd_kernel(step_ref, x_ref, ht_ref, h_ref, bias_ref, out_ref, *,
                       iter_stop, inv_alpha):
    # step_ref : (iter_stop,) f32  SMEM   (PositiveParameters params)
    # x_ref    : (bt, N)      f32  VMEM   batch-row tile
    # ht_ref   : (N, M)       bf16 VMEM   H^T (pre-transposed on host)
    # h_ref    : (M, N)       bf16 VMEM
    # bias_ref : (1, M)       f32  VMEM   (1/alpha - 1) * (H @ 1)
    # out_ref  : (bt, N)      f32  VMEM
    Ht = ht_ref[...]                                           # (N, M) bf16, VMEM-resident
    Hm = h_ref[...]                                            # (M, N) bf16, VMEM-resident

    # --- acquire + prep fused:  m = (1/alpha) * x @ H^T + (1/alpha - 1) * (H @ 1) ---
    m = inv_alpha * jnp.dot(x_ref[...].astype(jnp.bfloat16), Ht,
                            preferred_element_type=jnp.float32) + bias_ref[...]

    # --- LPGD iterations (denoiser = Identity) ---------------------------------
    # PositiveParameters.forward(): abs() on the step sizes (scalar path, free).
    # iteration 0 shortcut: x0 = 0  ->  x1 = |step0| * (m @ H)
    step0 = jnp.abs(step_ref[0])
    x = jnp.dot((step0 * m).astype(jnp.bfloat16), Hm,
                preferred_element_type=jnp.float32)            # (bt, N) f32, kept in vregs
    for i in range(1, iter_stop):                              # static unroll (iter_stop=3)
        proj = jnp.dot(x.astype(jnp.bfloat16), Ht,
                       preferred_element_type=jnp.float32)     # (bt, M)
        res = jnp.abs(step_ref[i]) * (proj - m)                # scale (bt, M), not (bt, N)
        x = x - jnp.dot(res.astype(jnp.bfloat16), Hm,
                        preferred_element_type=jnp.float32)

    out_ref[...] = x                                           # single store of the iterate


# ---- wrapper ------------------------------------------------------------------
@functools.partial(jax.jit, static_argnames=("alpha", "batch_tile"))
def learned_pgd_forward(x, H_bf16, Ht_bf16, h_ones, step, alpha=1.0, batch_tile=None):
    b, c, h, w = x.shape
    n = h * w
    m_pat = H_bf16.shape[0]
    iter_stop = int(step.shape[0])
    bc = b * c

    x_flat = x.reshape(bc, n).astype(jnp.float32)

    # batch tile: multiple of 8 sublanes; caps at 256 to fill the MXU on large batches.
    bt = batch_tile if batch_tile is not None else min(256, _round_up(bc, 8))
    bc_pad = _round_up(bc, bt)
    if bc_pad != bc:
        x_flat = jnp.pad(x_flat, ((0, bc_pad - bc), (0, 0)))
    grid = (bc_pad // bt,)

    bias = ((1.0 / float(alpha)) - 1.0) * h_ones.reshape(1, m_pat).astype(jnp.float32)

    kern = functools.partial(_fused_lpgd_kernel,
                             iter_stop=iter_stop, inv_alpha=1.0 / float(alpha))

    # 2*iter_stop matmuls of (bc_pad x N x M); advisory estimate for XLA's scheduler.
    flops = 2 * iter_stop * 2 * bc_pad * n * m_pat
    bytes_accessed = (2 * m_pat * n * 2            # H + Ht (bf16)
                      + 2 * bc_pad * n * 4         # x + out (f32)
                      + m_pat * 4 + iter_stop * 4)  # bias + step

    out = pl.pallas_call(
        kern,
        out_shape=jax.ShapeDtypeStruct((bc_pad, n), jnp.float32),
        grid=grid,
        in_specs=[
            pl.BlockSpec(memory_space=pltpu.MemorySpace.SMEM),   # step sizes (scalars)
            pl.BlockSpec((bt, n), lambda i: (i, 0)),             # x batch-row tile
            pl.BlockSpec((n, m_pat), lambda i: (0, 0)),          # Ht, VMEM-resident
            pl.BlockSpec((m_pat, n), lambda i: (0, 0)),          # H,  VMEM-resident
            pl.BlockSpec((1, m_pat), lambda i: (0, 0)),          # bias, VMEM-resident
        ],
        out_specs=pl.BlockSpec((bt, n), lambda i: (i, 0)),
        compiler_params=pltpu.CompilerParams(
            dimension_semantics=("parallel",)),                  # 2 TCs on v7x
        cost_estimate=pl.CostEstimate(flops=flops, transcendentals=0,
                                      bytes_accessed=bytes_accessed),
        # TODO(synk): for large N (e.g. 64x64 -> H bf16 = 16 MiB), budget residency
        # against v7x's 64 MiB VMEM (32 MiB default scoped); tile K or raise
        # vmem_limit_bytes with headroom.
    )(step.astype(jnp.float32), x_flat, Ht_bf16, H_bf16, bias)

    return out[:bc].reshape(b, c, h, w)


# ---- pure-JAX references --------------------------------------------------------
def reference_forward_full(x, H, step, alpha):
    """Original spyrit path: explicit split matrix P, full f32, no shortcuts."""
    hp = lax.Precision.HIGHEST
    b, c, hh, ww = x.shape
    n = hh * ww
    m_pat = H.shape[0]
    P = jnp.concatenate([jnp.maximum(H, 0.0), jnp.maximum(-H, 0.0)], axis=0)   # (2M, N)
    h_ones = H @ jnp.ones((n,), jnp.float32)
    step = jnp.abs(step.astype(jnp.float32))          # PositiveParameters.forward()
    xf = x.reshape(b * c, n).astype(jnp.float32)
    xn = (xf + 1.0) * 0.5                             # NoNoise normalization
    y = jnp.dot(xn, P.T, precision=hp)                # acquire
    m = (2.0 / alpha) * (y[:, :m_pat] - y[:, m_pat:]) - h_ones[None, :]   # SplitPoisson
    xk = jnp.zeros((b * c, n), jnp.float32)
    for i in range(int(step.shape[0])):
        proj = jnp.dot(xk, H.T, precision=hp)
        xk = xk - step[i] * jnp.dot(proj - m, H, precision=hp)
    return xk.reshape(b, c, hh, ww)


def reference_forward_bf16_matched(x, H_bf16, Ht_bf16, h_ones, step, alpha):
    """Mirrors the kernel math (P dropped, bf16 matmul operands, f32 accumulation)."""
    b, c, hh, ww = x.shape
    n = hh * ww
    m_pat = H_bf16.shape[0]
    step = jnp.abs(step.astype(jnp.float32))
    bias = ((1.0 / alpha) - 1.0) * h_ones.reshape(1, m_pat).astype(jnp.float32)
    dot = lambda a, b_: jnp.dot(a.astype(jnp.bfloat16), b_,
                                preferred_element_type=jnp.float32)
    xf = x.reshape(b * c, n).astype(jnp.float32)
    m = (1.0 / alpha) * dot(xf, Ht_bf16) + bias
    xk = dot(step[0] * m, H_bf16)
    for i in range(1, int(step.shape[0])):
        proj = dot(xk, Ht_bf16)
        xk = xk - dot(step[i] * (proj - m), H_bf16)
    return xk.reshape(b, c, hh, ww)


if __name__ == "__main__":
    # deterministic example input
    key = jax.random.PRNGKey(0)
    x = jax.random.uniform(key, (B, C, IMG_H, IMG_W), jnp.float32, minval=-1.0, maxval=1.0)

    # deterministic operators: Sylvester-Hadamard rows (like HadamSplit)
    had = np.array([[1.0]], dtype=np.float64)
    while had.shape[0] < N:
        had = np.kron(had, np.array([[1.0, 1.0], [1.0, -1.0]]))
    H_np = had[:M].astype(np.float32)                           # (M, N)

    H_f32 = jnp.asarray(H_np)
    # entries are exactly {0, +1, -1} -> exact in bf16 (native MXU input)
    H_bf16 = H_f32.astype(jnp.bfloat16)                         # (M, N)
    Ht_bf16 = H_f32.T.astype(jnp.bfloat16)                      # (N, M) host pre-transpose
    # h_ones = H @ 1 is a static property of H: computed once, outside the forward
    h_ones = H_f32 @ jnp.ones((N,), jnp.float32)

    # step = 1/meas_op.N, step_decay = 1 -> [1/N] * iter_stop (PositiveParameters params)
    step = jnp.full((ITER_STOP,), 1.0 / N, dtype=jnp.float32)

    out = learned_pgd_forward(x, H_bf16, Ht_bf16, h_ones, step, alpha=ALPHA)
    out = jax.block_until_ready(out)
    assert out.shape == (B, C, IMG_H, IMG_W)

    # tight check vs a reference that mirrors the kernel's bf16 matmul-operand casts
    ref_bf16 = reference_forward_bf16_matched(x, H_bf16, Ht_bf16, h_ones, step, ALPHA)
    np.testing.assert_allclose(np.asarray(out), np.asarray(ref_bf16), rtol=1e-2, atol=1e-2)

    # loose check vs the ORIGINAL full-precision P-path (validates the dropped-P algebra
    # and the iteration-0 shortcut; residual error is bf16 activation quantization)
    ref_f32 = reference_forward_full(x, H_f32, step, ALPHA)
    np.testing.assert_allclose(np.asarray(out), np.asarray(ref_f32), rtol=2e-2, atol=2e-2)

    print("KERNEL_OK")
</pallas_src>

<mosaic_0001>
module attributes {stable_mosaic.version = 11 : i64} {
  func.func @_fused_lpgd_kernel(%arg0: i32, %arg1: memref<3xf32, #tpu.memory_space<smem>>, %arg2: memref<8x256xf32, #tpu.memory_space<vmem>>, %arg3: memref<256x128xbf16, #tpu.memory_space<vmem>>, %arg4: memref<128x256xbf16, #tpu.memory_space<vmem>>, %arg5: memref<1x128xf32, #tpu.memory_space<vmem>>, %arg6: memref<8x256xf32, #tpu.memory_space<vmem>>) attributes {dimension_semantics = [#tpu.dimension_semantics<parallel>], iteration_bounds = array<i64: 1>, scalar_prefetch = 0 : i64, scratch_operands = 0 : i64, tpu.core_type = #tpu.core_type<tc>, window_params = [{transform_indices = @transform_0, window_bounds = array<i64: 3>}, {transform_indices = @transform_1, window_bounds = array<i64: 8, 256>}, {pipeline_mode = #tpu.pipeline_mode<synchronous>, transform_indices = @transform_2, window_bounds = array<i64: 256, 128>}, {pipeline_mode = #tpu.pipeline_mode<synchronous>, transform_indices = @transform_3, window_bounds = array<i64: 128, 256>}, {pipeline_mode = #tpu.pipeline_mode<synchronous>, transform_indices = @transform_4, window_bounds = array<i64: 1, 128>}, {transform_indices = @transform_5, window_bounds = array<i64: 8, 256>}]} {
    %c0 = arith.constant 0 : index
    %c0_0 = arith.constant 0 : index
    %0 = vector.load %arg3[%c0, %c0_0] : memref<256x128xbf16, #tpu.memory_space<vmem>>, vector<256x128xbf16>
    %c0_1 = arith.constant 0 : index
    %c0_2 = arith.constant 0 : index
    %1 = vector.load %arg4[%c0_1, %c0_2] : memref<128x256xbf16, #tpu.memory_space<vmem>>, vector<128x256xbf16>
    %c0_3 = arith.constant 0 : index
    %c0_4 = arith.constant 0 : index
    %2 = vector.load %arg2[%c0_3, %c0_4] : memref<8x256xf32, #tpu.memory_space<vmem>>, vector<8x256xf32>
    %3 = arith.truncf %2 : vector<8x256xf32> to vector<8x256xbf16>
    %cst = arith.constant dense<0.000000e+00> : vector<8x128xf32>
    %4 = tpu.matmul %3, %0, %cst {dimension_numbers = #tpu.dot_dimension_numbers<[1], [0], [0], [1], [0, 0, 1, 1], [], []>} : vector<8x256xbf16>, vector<256x128xbf16>, vector<8x128xf32> -> vector<8x128xf32>
    %cst_5 = arith.constant 1.000000e+00 : f32
    %5 = vector.broadcast %cst_5 : f32 to vector<8x128xf32>
    %6 = arith.mulf %5, %4 : vector<8x128xf32>
    %c0_6 = arith.constant 0 : index
    %c0_7 = arith.constant 0 : index
    %7 = vector.load %arg5[%c0_6, %c0_7] : memref<1x128xf32, #tpu.memory_space<vmem>>, vector<1x128xf32>
    %8 = vector.broadcast %7 : vector<1x128xf32> to vector<8x128xf32>
    %9 = arith.addf %6, %8 : vector<8x128xf32>
    %c0_8 = arith.constant 0 : index
    %10 = memref.load %arg1[%c0_8] : memref<3xf32, #tpu.memory_space<smem>>
    %11 = math.absf %10 : f32
    %12 = vector.broadcast %11 : f32 to vector<8x128xf32>
    %13 = arith.mulf %12, %9 : vector<8x128xf32>
    %14 = arith.truncf %13 : vector<8x128xf32> to vector<8x128xbf16>
    %cst_9 = arith.constant dense<0.000000e+00> : vector<8x256xf32>
    %15 = tpu.matmul %14, %1, %cst_9 {dimension_numbers = #tpu.dot_dimension_numbers<[1], [0], [0], [1], [0, 0, 1, 1], [], []>} : vector<8x128xbf16>, vector<128x256xbf16>, vector<8x256xf32> -> vector<8x256xf32>
    %16 = arith.truncf %15 : vector<8x256xf32> to vector<8x256xbf16>
    %cst_10 = arith.constant dense<0.000000e+00> : vector<8x128xf32>
    %17 = tpu.matmul %16, %0, %cst_10 {dimension_numbers = #tpu.dot_dimension_numbers<[1], [0], [0], [1], [0, 0, 1, 1], [], []>} : vector<8x256xbf16>, vector<256x128xbf16>, vector<8x128xf32> -> vector<8x128xf32>
    %c1 = arith.constant 1 : index
    %18 = memref.load %arg1[%c1] : memref<3xf32, #tpu.memory_space<smem>>
    %19 = math.absf %18 : f32
    %20 = arith.subf %17, %9 : vector<8x128xf32>
    %21 = vector.broadcast %19 : f32 to vector<8x128xf32>
    %22 = arith.mulf %21, %20 : vector<8x128xf32>
    %23 = arith.truncf %22 : vector<8x128xf32> to vector<8x128xbf16>
    %cst_11 = arith.constant dense<0.000000e+00> : vector<8x256xf32>
    %24 = tpu.matmul %23, %1, %cst_11 {dimension_numbers = #tpu.dot_dimension_numbers<[1], [0], [0], [1], [0, 0, 1, 1], [], []>} : vector<8x128xbf16>, vector<128x256xbf16>, vector<8x256xf32> -> vector<8x256xf32>
    %25 = arith.subf %15, %24 : vector<8x256xf32>
    %26 = arith.truncf %25 : vector<8x256xf32> to vector<8x256xbf16>
    %cst_12 = arith.constant dense<0.000000e+00> : vector<8x128xf32>
    %27 = tpu.matmul %26, %0, %cst_12 {dimension_numbers = #tpu.dot_dimension_numbers<[1], [0], [0], [1], [0, 0, 1, 1], [], []>} : vector<8x256xbf16>, vector<256x128xbf16>, vector<8x128xf32> -> vector<8x128xf32>
    %c2 = arith.constant 2 : index
    %28 = memref.load %arg1[%c2] : memref<3xf32, #tpu.memory_space<smem>>
    %29 = math.absf %28 : f32
    %30 = arith.subf %27, %9 : vector<8x128xf32>
    %31 = vector.broadcast %29 : f32 to vector<8x128xf32>
    %32 = arith.mulf %31, %30 : vector<8x128xf32>
    %33 = arith.truncf %32 : vector<8x128xf32> to vector<8x128xbf16>
    %cst_13 = arith.constant dense<0.000000e+00> : vector<8x256xf32>
    %34 = tpu.matmul %33, %1, %cst_13 {dimension_numbers = #tpu.dot_dimension_numbers<[1], [0], [0], [1], [0, 0, 1, 1], [], []>} : vector<8x128xbf16>, vector<128x256xbf16>, vector<8x256xf32> -> vector<8x256xf32>
    %35 = arith.subf %25, %34 : vector<8x256xf32>
    %c0_14 = arith.constant 0 : index
    %c0_15 = arith.constant 0 : index
    %36 = vector.load %arg6[%c0_14, %c0_15] : memref<8x256xf32, #tpu.memory_space<vmem>>, vector<8x256xf32>
    tpu.vector_store %arg6[%c0_14, %c0_15], %35 {strides = array<i32>} : memref<8x256xf32, #tpu.memory_space<vmem>>, vector<8x256xf32>,
    return
  }
  func.func @transform_0(%arg0: i32) -> i32 {
    %c0_i32 = arith.constant 0 : i32
    %c0_i32_0 = arith.constant 0 : i32
    return %c0_i32 : i32
  }
  func.func @transform_1(%arg0: i32) -> (i32, i32) {
    %c0_i32 = arith.constant 0 : i32
    %c0_i32_0 = arith.constant 0 : i32
    return %arg0, %c0_i32 : i32, i32
  }
  func.func @transform_2(%arg0: i32) -> (i32, i32) {
    %c0_i32 = arith.constant 0 : i32
    %c0_i32_0 = arith.constant 0 : i32
    %c0_i32_1 = arith.constant 0 : i32
    return %c0_i32, %c0_i32_0 : i32, i32
  }
  func.func @transform_3(%arg0: i32) -> (i32, i32) {
    %c0_i32 = arith.constant 0 : i32
    %c0_i32_0 = arith.constant 0 : i32
    %c0_i32_1 = arith.constant 0 : i32
    return %c0_i32, %c0_i32_0 : i32, i32
  }
  func.func @transform_4(%arg0: i32) -> (i32, i32) {
    %c0_i32 = arith.constant 0 : i32
    %c0_i32_0 = arith.constant 0 : i32
    %c0_i32_1 = arith.constant 0 : i32
    return %c0_i32, %c0_i32_0 : i32, i32
  }
  func.func @transform_5(%arg0: i32) -> (i32, i32) {
    %c0_i32 = arith.constant 0 : i32
    %c0_i32_0 = arith.constant 0 : i32
    return %arg0, %c0_i32 : i32, i32
  }
}

</mosaic_0001>

<bundles_post_ra>
// kernel: learned_pgd_forward.1
= control target key start
LH: loop header
LB: loop body
LE: loop exit
PB: predicated region body
PF: predicated region fallthrough
CT: control target
= control target key end

     0   :  { %10 = vsyncpa [#allocation4], 0  ;;  %s1024_s0 = inlined_call_operand.vmem [shape: f32[3], index: 0, kind: input, shape index: {}]   ;;  %s1025_s1 = inlined_call_operand.vmem [shape: f32[8,256], index: 1, kind: input, shape index: {}]   ;;  %s1026_s2 = inlined_call_operand.vmem [shape: bf16[256,128], index: 2, kind: input, shape index: {}]   ;;  %s1027_s3 = inlined_call_operand.hbm [shape: bf16[128,256], index: 3, kind: input, shape index: {}]   ;;  %s1028_s4 = inlined_call_operand.vmem [shape: f32[1,128], index: 4, kind: input, shape index: {}]   ;;  %s1029_s5 = inlined_call_operand.vmem [shape: f32[8,256], index: 5, kind: output, shape index: {}]  }
   0x1   :  { %s18_s20 = sshll.u32 %s1024_s0, 4  ;;  %s19_s20 = int_to_ptr.vmem [resolvable:$true] %s18_s20 }
   0x2   :  { %11 = vsyncpa [#allocation3], 0  ;;  %s705_s21 = scalar_lea.vmem %s19_s20, 16  ;;  %p710_p1 = scmp.lt.s32.totalorder %s19_s20, %s19_s20 }
   0x3   :  { %p706_p0 = scmp.ne.s32.totalorder %s19_s20, %s705_s21  ;;  %p711_p2 = scmp.lt.s32.totalorder %s705_s21, %s705_s21 }
   0x5   :  { %p712_p3 = por %p711_p2, %p710_p1 }
   0x7   :  { %p713_p4 = pnand %p712_p3, %p706_p0 }
   0x9   :  { %716 = shalt.err (!%p713_p4)
}
   0xa   :  { %s743_s22 = smov [#allocation2]   ;;  %s744_s23 = smov [#allocation5]  }
   0xb   :  { %21 = dma.vmem_to_smem %s19_s20, 16, %s743_s22, [#allocation4]  }
   0xc   :  { %s31_s24 = sshll.u32 %s744_s23, 4  ;;  %s717_s27 = scalar_lea.hbm %s1027_s3, 2048  ;;  %s32_s24 = int_to_ptr.vmem [resolvable:$true] %s31_s24 }
   0xd   :  { %p718_p5 = scmp.ne.s32.totalorder %s1027_s3, %s717_s27  ;;  %p721_p6 = scmp.lt.u32.totalorder %s717_s27, %s1027_s3 }
   0xf   :  { %p723_p7 = pnand %p721_p6, %p718_p5 }
  0x11   :  { %726 = shalt.err (!%p723_p7)
}
  0x12   :  { %s727_s6 = scalar_lea.vmem %s32_s24, 2048  ;;  %p732_p9 = scmp.lt.s32.totalorder %s32_s24, %s32_s24 }
  0x13   :  { %p728_p8 = scmp.ne.s32.totalorder %s32_s24, %s727_s6  ;;  %p733_p10 = scmp.lt.s32.totalorder %s727_s6, %s727_s6 }
  0x15   :  { %p734_p11 = por %p733_p10, %p732_p9 }
  0x17   :  { %p735_p12 = pnand %p734_p11, %p728_p8 }
  0x19   :  { %738 = shalt.err (!%p735_p12)
}
  0x1a   :  { %s745_s7 = smov 128   ;;  %s746_s8 = smov 8  }
  0x1b   :  { %37 = dma.hbm_to_vmem [thread:$0]  %s1027_s3, 2048, %s32_s24, [#allocation3], %s745_s7, %s745_s7, %s746_s8  }
  0x1c   :  { %739 = dma.done.wait [#allocation4], 16  }
  0x1d   :  { %740 = vsyncadd [#allocation4], 4294967280 }
  0x1e   :  { %741 = dma.done.wait [#allocation3], 2048  }
  0x1f   :  { %742 = vsyncadd [#allocation3], 4294965248 }
  0x20   :  { %46 = sfence }
  0x21   :  { %v796_v0 = vld [vmem:[%s1026_s2 + $0x40] sm:$0xff]   ;;  %v807_v2 = vld [vmem:[%s1026_s2 + $0x48] sm:$0xff]   ;;  %v819_v4 = vld [vmem:[%s1026_s2 + $0x50] sm:$0xff]   ;;  %v747_v36 = vmov 0   ;;  %s593_s22 = sld [smem:[#allocation2 + $0x2]] }
  0x22   :  { %v801_v1 = vld [vmem:[%s1026_s2] sm:$0xff]   ;;  %594 = vmatprep.subr.bf16.mxu0 %v796_v0  ;;  %v813_v3 = vld [vmem:[%s1026_s2 + $0x8] sm:$0xff]   ;;  %v825_v5 = vld [vmem:[%s1026_s2 + $0x10] sm:$0xff]   ;;  %360 = vmatprep.mubr.bf16.mxu1 %v747_v36 }
  0x23   :  { %595 = vmatpush3.bf16.msra.mxu0 %v801_v1  ;;  %v831_v6 = vld [vmem:[%s1026_s2 + $0x58] sm:$0xff]   ;;  %v843_v8 = vld [vmem:[%s1026_s2 + $0x60] sm:$0xff]   ;;  %v855_v10 = vld [vmem:[%s1026_s2 + $0x68] sm:$0xff]  }
  0x24   :  { %596 = vmatprep.subr.bf16.mxu0 %v807_v2  ;;  %v837_v7 = vld [vmem:[%s1026_s2 + $0x18] sm:$0xff]   ;;  %v849_v9 = vld [vmem:[%s1026_s2 + $0x20] sm:$0xff]   ;;  %v97_v11 = vld [vmem:[%s1025_s1 + $0x8] sm:$0xff] }
  0x25   :  { %v99_v12 = vpack.c.bf16 %v97_v11, %v97_v11  ;;  %v860_v13 = vld [vmem:[#allocation5 + $0x4] ss:$8 sps:$4 sm:$0xff]   ;;  %v862_v14 = vld [vmem:[#allocation5] ss:$8 sps:$4 sm:$0xff]   ;;  %v864_v15 = vld [vmem:[#allocation5 + $0x14] ss:$8 sps:$4 sm:$0xff]  }
  0x26   :  { %v870_v16 = vld [vmem:[%s1026_s2 + $0x28] sm:$0xff]   ;;  %v876_v17 = vld [vmem:[%s1026_s2 + $0x70] sm:$0xff]   ;;  %328 = vmatprep.subr.bf16.mxu1 %v860_v13  ;;  %v895_v21 = vld [vmem:[%s1026_s2 + $0x78] sm:$0xff]  }
  0x27   :  { %597 = vmatpush3.bf16.msra.mxu0 %v813_v3  ;;  %235 = vmatprep.mubr.bf16.mxu0 %v99_v12  ;;  %v880_v18 = vld [vmem:[#allocation5 + $0x10] ss:$8 sps:$4 sm:$0xff]   ;;  %v883_v19 = vld [vmem:[#allocation5 + $0x24] ss:$8 sps:$4 sm:$0xff]   ;;  %v897_v22 = vld [vmem:[#allocation5 + $0x20] ss:$8 sps:$4 sm:$0xff]  }
  0x28   :  { %598 = vmatprep.subr.bf16.mxu0 %v819_v4  ;;  %329 = vmatpush1.bf16.msra.mxu1 %v862_v14  ;;  %v889_v20 = vld [vmem:[%s1026_s2 + $0x30] sm:$0xff]   ;;  %v907_v24 = vld [vmem:[%s1026_s2 + $0x38] sm:$0xff]   ;;  %v96_v25 = vld [vmem:[%s1025_s1] sm:$0xff]  ;;  %s243_s1 = sld [smem:[#allocation2]]  ;;  %s503_s23 = sand.u32 2147483647, %s593_s22 }
  0x29   :  { %330 = vmatprep.subr.bf16.mxu1 %v864_v15  ;;  %v901_v23 = vld [vmem:[#allocation5 + $0x34] ss:$8 sps:$4 sm:$0xff]   ;;  %v914_v26 = vld [vmem:[#allocation5 + $0x30] ss:$8 sps:$4 sm:$0xff]   ;;  %v98_v27 = vpack.c.bf16 %v96_v25, %v96_v25  ;;  %v917_v28 = vld [vmem:[#allocation5 + $0x44] ss:$8 sps:$4 sm:$0xff]  }
  0x2a   :  { %v922_v29 = vld [vmem:[#allocation5 + $0x40] ss:$8 sps:$4 sm:$0xff]   ;;  %v925_v30 = vld [vmem:[#allocation5 + $0x54] ss:$8 sps:$4 sm:$0xff]   ;;  %v930_v31 = vld [vmem:[#allocation5 + $0x50] ss:$8 sps:$4 sm:$0xff]  }
  0x2b   :  { %599 = vmatpush3.bf16.msra.mxu0 %v825_v5  ;;  %v948_v32 = vld [vmem:[#allocation5 + $0x64] ss:$8 sps:$4 sm:$0xff]   ;;  %v950_v33 = vld [vmem:[#allocation5 + $0x60] ss:$8 sps:$4 sm:$0xff]   ;;  %v954_v34 = vld [vmem:[#allocation5 + $0x74] ss:$8 sps:$4 sm:$0xff]  }
  0x2c   :  { %600 = vmatprep.subr.bf16.mxu0 %v831_v6  ;;  %331 = vmatpush1.bf16.msra.mxu1 %v880_v18  ;;  %v956_v35 = vld [vmem:[#allocation5 + $0x70] ss:$8 sps:$4 sm:$0xff]   ;;  %v559_v38 = vld [vmem:[%s1028_s4] ss:$0 sm:$0xff]  ;;  %s592_s4 = sld [smem:[#allocation2 + $0x1]] }
  0x2d   :  { %332 = vmatprep.subr.bf16.mxu1 %v883_v19 }
  0x2e   :  { %s244_s2 = sand.u32 2147483647, %s243_s1 }
  0x2f   :  { %601 = vmatpush3.bf16.msra.mxu0 %v837_v7  ;;  %v245_v43 = vstv %s244_s2 }
  0x30   :  { %602 = vmatprep.subr.bf16.mxu0 %v843_v8  ;;  %333 = vmatpush1.bf16.msra.mxu1 %v897_v22 }
  0x31   :  { %334 = vmatprep.subr.bf16.mxu1 %v901_v23 }
  0x32   :  { %s412_s21 = sand.u32 2147483647, %s592_s4 }
  0x33   :  { %603 = vmatpush3.bf16.msra.mxu0 %v849_v9  ;;  %v414_v57 = vstv %s412_s21 }
  0x34   :  { %604 = vmatprep.subr.bf16.mxu0 %v855_v10  ;;  %335 = vmatpush1.bf16.msra.mxu1 %v914_v26 }
  0x35   :  { %336 = vmatprep.subr.bf16.mxu1 %v917_v28 }
  0x37   :  { %605 = vmatpush3.bf16.msra.mxu0 %v870_v16 }
  0x38   :  { %606 = vmatprep.subr.bf16.mxu0 %v876_v17  ;;  %337 = vmatpush1.bf16.msra.mxu1 %v922_v29 }
  0x39   :  { %338 = vmatprep.subr.bf16.mxu1 %v925_v30 }
  0x3b   :  { %607 = vmatpush3.bf16.msra.mxu0 %v889_v20 }
  0x3c   :  { %608 = vmatprep.subr.bf16.mxu0 %v895_v21  ;;  %339 = vmatpush1.bf16.msra.mxu1 %v930_v31 }
  0x3d   :  { %340 = vmatprep.subr.bf16.mxu1 %v948_v32 }
  0x3f   :  { %609 = vmatpush3.bf16.msra.mxu0 %v907_v24 }
  0x40   :  { %616 = vmatprep.subr.bf16.mxu0 %v796_v0  ;;  %341 = vmatpush1.bf16.msra.mxu1 %v950_v33 }
  0x41   :  { %342 = vmatprep.subr.bf16.mxu1 %v954_v34 }
  0x42   :  { %236 = vmatmul.mubr.bf16.vlgmr.msra.gmra.mrb[0].mxu0 %v98_v27 }
  0x43   :  { %617 = vmatpush3.bf16.msra.mxu0 %v801_v1 }
  0x44   :  { %618 = vmatprep.subr.bf16.mxu0 %v807_v2  ;;  %343 = vmatpush1.bf16.msra.mxu1 %v956_v35 }
  0x45   :  { %417 = vmatprep.subr.bf16.mxu1 %v860_v13 }
  0x47   :  { %619 = vmatpush3.bf16.msra.mxu0 %v813_v3 }
  0x48   :  { %620 = vmatprep.subr.bf16.mxu0 %v819_v4 }
  0x4b   :  { %621 = vmatpush3.bf16.msra.mxu0 %v825_v5 }
  0x4c   :  { %622 = vmatprep.subr.bf16.mxu0 %v831_v6 }
  0x4f   :  { %623 = vmatpush3.bf16.msra.mxu0 %v837_v7 }
  0x50   :  { %624 = vmatprep.subr.bf16.mxu0 %v843_v8 }
  0x53   :  { %625 = vmatpush3.bf16.msra.mxu0 %v849_v9 }
  0x54   :  { %626 = vmatprep.subr.bf16.mxu0 %v855_v10 }
  0x57   :  { %627 = vmatpush3.bf16.msra.mxu0 %v870_v16 }
  0x58   :  { %628 = vmatprep.subr.bf16.mxu0 %v876_v17 }
  0x5b   :  { %629 = vmatpush3.bf16.msra.mxu0 %v889_v20 }
  0x5c   :  { %630 = vmatprep.subr.bf16.mxu0 %v895_v21 }
  0x5f   :  { %631 = vmatpush3.bf16.msra.mxu0 %v907_v24 }
  0x60   :  { %638 = vmatprep.subr.bf16.mxu0 %v796_v0 }
 0x115   :  { %v610_v37 = vpop.f32.mrb[0].mxu0 }
 0x116   :  { %v611_v39 = vpop.f32.mrb[1].mxu0 }
 0x117   :  { %v612_v40 = vadd.f32 %v611_v39, %v610_v37  ;;  %v613_v41 = vpop.f32.mrb[2].mxu0 }
 0x118   :  { %v614_v42 = vpop.f32.mrb[3].mxu0 }
 0x119   :  { %v965_v44 = vadd.f32 %v612_v40, %v559_v38 }
 0x11b   :  { %v246_v45 = vmul.f32 %v245_v43, %v965_v44 }
 0x11d   :  { %v247_v46 = vpack.c.bf16 %v246_v45, %v246_v45 }
 0x11f   :  { %361 = vmatmul.mubr.bf16.vlgmr.msra.gmra.mrb[0].mxu1 %v247_v46 }
 0x120   :  { %418 = vmatpush1.bf16.msra.mxu1 %v862_v14  ;;  %449 = vmatprep.mubr.bf16.mxu1 %v747_v36 }
 0x121   :  { %419 = vmatprep.subr.bf16.mxu1 %v864_v15 }
 0x124   :  { %420 = vmatpush1.bf16.msra.mxu1 %v880_v18 }
 0x125   :  { %421 = vmatprep.subr.bf16.mxu1 %v883_v19 }
 0x128   :  { %422 = vmatpush1.bf16.msra.mxu1 %v897_v22 }
 0x129   :  { %423 = vmatprep.subr.bf16.mxu1 %v901_v23 }
 0x12c   :  { %424 = vmatpush1.bf16.msra.mxu1 %v914_v26 }
 0x12d   :  { %425 = vmatprep.subr.bf16.mxu1 %v917_v28 }
 0x130   :  { %426 = vmatpush1.bf16.msra.mxu1 %v922_v29 }
 0x131   :  { %427 = vmatprep.subr.bf16.mxu1 %v925_v30 }
 0x134   :  { %428 = vmatpush1.bf16.msra.mxu1 %v930_v31 }
 0x135   :  { %429 = vmatprep.subr.bf16.mxu1 %v948_v32 }
 0x138   :  { %430 = vmatpush1.bf16.msra.mxu1 %v950_v33 }
 0x139   :  { %431 = vmatprep.subr.bf16.mxu1 %v954_v34 }
 0x13c   :  { %432 = vmatpush1.bf16.msra.mxu1 %v956_v35 }
 0x13d   :  { %508 = vmatprep.subr.bf16.mxu1 %v860_v13 }
 0x1f2   :  { %v362_v47 = vpop.f32.mrb[0].mxu1 }
 0x1f3   :  { %v364_v48 = vpop.f32.mrb[1].mxu1  ;;  %v369_v51 = vpack.c.bf16 %v362_v47, %v362_v47 }
 0x1f4   :  { %v370_v49 = vpack.c.bf16 %v364_v48, %v364_v48  ;;  %v366_v50 = vpop.f32.mrb[2].mxu1 }
 0x1f5   :  { %v367_v52 = vpop.f32.mrb[3].mxu1 }
 0x1f6   :  { %403 = vmatprep.mubr.bf16.mxu0 %v370_v49 }
 0x1f7   :  { %404 = vmatmul.mubr.bf16.vlgmr.msra.gmra.mrb[4].mxu0 %v369_v51 }
 0x1f8   :  { %639 = vmatpush3.bf16.msra.mxu0 %v801_v1 }
 0x1f9   :  { %640 = vmatprep.subr.bf16.mxu0 %v807_v2 }
 0x1fc   :  { %641 = vmatpush3.bf16.msra.mxu0 %v813_v3 }
 0x1fd   :  { %642 = vmatprep.subr.bf16.mxu0 %v819_v4 }
 0x200   :  { %643 = vmatpush3.bf16.msra.mxu0 %v825_v5 }
 0x201   :  { %644 = vmatprep.subr.bf16.mxu0 %v831_v6 }
 0x204   :  { %645 = vmatpush3.bf16.msra.mxu0 %v837_v7 }
 0x205   :  { %646 = vmatprep.subr.bf16.mxu0 %v843_v8 }
 0x208   :  { %647 = vmatpush3.bf16.msra.mxu0 %v849_v9 }
 0x209   :  { %648 = vmatprep.subr.bf16.mxu0 %v855_v10  ;;  %v505_v10 = vstv %s503_s23 }
 0x20c   :  { %649 = vmatpush3.bf16.msra.mxu0 %v870_v16 }
 0x20d   :  { %650 = vmatprep.subr.bf16.mxu0 %v876_v17 }
 0x210   :  { %651 = vmatpush3.bf16.msra.mxu0 %v889_v20 }
 0x211   :  { %652 = vmatprep.subr.bf16.mxu0 %v895_v21 }
 0x214   :  { %653 = vmatpush3.bf16.msra.mxu0 %v907_v24 }
 0x2ca   :  { %v632_v53 = vpop.f32.mrb[4].mxu0 }
 0x2cb   :  { %v633_v54 = vpop.f32.mrb[5].mxu0 }
 0x2cc   :  { %v634_v55 = vadd.f32 %v633_v54, %v632_v53  ;;  %v635_v56 = vpop.f32.mrb[6].mxu0 }
 0x2cd   :  { %v636_v58 = vpop.f32.mrb[7].mxu0 }
 0x2ce   :  { %v413_v59 = vsub.f32 %v634_v55, %v965_v44 }
 0x2d0   :  { %v415_v60 = vmul.f32 %v414_v57, %v413_v59 }
 0x2d2   :  { %v416_v61 = vpack.c.bf16 %v415_v60, %v415_v60 }
 0x2d4   :  { %450 = vmatmul.mubr.bf16.vlgmr.msra.gmra.mrb[4].mxu1 %v416_v61 }
 0x2d5   :  { %509 = vmatpush1.bf16.msra.mxu1 %v862_v14  ;;  %540 = vmatprep.mubr.bf16.mxu1 %v747_v36 }
 0x2d6   :  { %510 = vmatprep.subr.bf16.mxu1 %v864_v15 }
 0x2d9   :  { %511 = vmatpush1.bf16.msra.mxu1 %v880_v18 }
 0x2da   :  { %512 = vmatprep.subr.bf16.mxu1 %v883_v19 }
 0x2dd   :  { %513 = vmatpush1.bf16.msra.mxu1 %v897_v22 }
 0x2de   :  { %514 = vmatprep.subr.bf16.mxu1 %v901_v23 }
 0x2e1   :  { %515 = vmatpush1.bf16.msra.mxu1 %v914_v26 }
 0x2e2   :  { %516 = vmatprep.subr.bf16.mxu1 %v917_v28 }
 0x2e5   :  { %517 = vmatpush1.bf16.msra.mxu1 %v922_v29 }
 0x2e6   :  { %518 = vmatprep.subr.bf16.mxu1 %v925_v30 }
 0x2e9   :  { %519 = vmatpush1.bf16.msra.mxu1 %v930_v31 }
 0x2ea   :  { %520 = vmatprep.subr.bf16.mxu1 %v948_v32 }
 0x2ed   :  { %521 = vmatpush1.bf16.msra.mxu1 %v950_v33 }
 0x2ee   :  { %522 = vmatprep.subr.bf16.mxu1 %v954_v34 }
 0x2f1   :  { %523 = vmatpush1.bf16.msra.mxu1 %v956_v35 }
 0x3a7   :  { %v451_v62 = vpop.f32.mrb[4].mxu1 }
 0x3a8   :  { %v458_v63 = vsub.f32 %v362_v47, %v451_v62  ;;  %v453_v0 = vpop.f32.mrb[5].mxu1 }
 0x3a9   :  { %v459_v1 = vsub.f32 %v364_v48, %v453_v0  ;;  %v455_v2 = vpop.f32.mrb[6].mxu1 }
 0x3aa   :  { %v456_v3 = vpop.f32.mrb[7].mxu1  ;;  %v460_v5 = vpack.c.bf16 %v458_v63, %v458_v63 }
 0x3ab   :  { %v461_v4 = vpack.c.bf16 %v459_v1, %v459_v1 }
 0x3ad   :  { %494 = vmatprep.mubr.bf16.mxu0 %v461_v4 }
 0x3ae   :  { %495 = vmatmul.mubr.bf16.vlgmr.msra.gmra.mrb[8].mxu0 %v460_v5 }
 0x481   :  { %v654_v6 = vpop.f32.mrb[8].mxu0 }
 0x482   :  { %v655_v7 = vpop.f32.mrb[9].mxu0 }
 0x483   :  { %v656_v8 = vadd.f32 %v655_v7, %v654_v6  ;;  %v657_v9 = vpop.f32.mrb[10].mxu0 }
 0x484   :  { %v658_v11 = vpop.f32.mrb[11].mxu0 }
 0x485   :  { %v504_v12 = vsub.f32 %v656_v8, %v965_v44 }
 0x487   :  { %v506_v13 = vmul.f32 %v505_v10, %v504_v12 }
 0x489   :  { %v507_v14 = vpack.c.bf16 %v506_v13, %v506_v13 }
 0x48b   :  { %541 = vmatmul.mubr.bf16.vlgmr.msra.gmra.mrb[8].mxu1 %v507_v14 }
 0x55e   :  { %v542_v15 = vpop.f32.mrb[8].mxu1 }
 0x55f   :  { %v549_v16 = vsub.f32 %v458_v63, %v542_v15  ;;  %v544_v17 = vpop.f32.mrb[9].mxu1 }
 0x560   :  { %v550_v18 = vsub.f32 %v459_v1, %v544_v17  ;;  %v546_v19 = vpop.f32.mrb[10].mxu1 }
 0x561   :  { %551 = vst [vmem:[%s1029_s5] sm:$0xff] %v549_v16  ;;  %v547_v20 = vpop.f32.mrb[11].mxu1 }
 0x562   :  { %552 = vst [vmem:[%s1029_s5 + $0x8] sm:$0xff] %v550_v18 }
 0x563   :  { %557 = vsyncpa [#allocation3], 1 }
 0x564   :  { %558 = vsyncpa [#allocation4], 1 }

</bundles_post_ra>
